<compile_context>
chip_gen: v7x
topology: tpu7x:2x2x1
jax: 0.10.0
libtpu: 0.0.40
codegen_flags: <defaults>
</compile_context>

<pallas_src>
import jax
import jax.numpy as jnp
from jax import lax
from jax.experimental import pallas as pl
from jax.experimental.pallas import tpu as pltpu

_LANE = 128
_BF16_SUBLANE = 16   # bf16 packs 16 rows per vreg (sublane pairs)
_MAX_TILE = 512      # K/N tile size for the DxD weights


def _round_up(x, m):
    return (x + m - 1) // m * m


def _pad2(x, rows, cols):
    r, c = x.shape
    return jnp.pad(x, ((0, rows - r), (0, cols - c)))


def _choose_tiles(D):
    """Return (Dp, T) with T | Dp, T a multiple of 128, T <= _MAX_TILE."""
    Dp = _round_up(D, _LANE)
    if Dp <= _MAX_TILE:
        return Dp, Dp
    Dp = _round_up(D, _MAX_TILE)
    return Dp, _MAX_TILE


def _node_co_predictor_kernel(src_ref, dst_ref, wsT_ref, bs_ref, wdT_ref, bd_ref,
                              o_ref, hs_acc, hd_acc):
    n = pl.program_id(0)          # output-dim tile of the projections
    k = pl.program_id(1)          # reduction (input-dim) tile
    nk = pl.num_programs(1)

    @pl.when(jnp.logical_and(n == 0, k == 0))
    def _init_out():
        o_ref[...] = jnp.zeros_like(o_ref)

    @pl.when(k == 0)
    def _init_proj():
        hs_acc[...] = jnp.zeros_like(hs_acc)
        hd_acc[...] = jnp.zeros_like(hd_acc)

    # Canonical [M,K]@[K,N] bf16 matmuls on the pre-transposed [in, out] weights,
    # accumulating in f32 scratch.
    hs_acc[...] += jnp.dot(src_ref[...], wsT_ref[...],
                           preferred_element_type=jnp.float32)
    hd_acc[...] += jnp.dot(dst_ref[...], wdT_ref[...],
                           preferred_element_type=jnp.float32)

    @pl.when(k == nk - 1)
    def _finalize_tile():
        hs = hs_acc[...] + bs_ref[...]          # [Bp, T] f32
        hd = hd_acc[...] + bd_ref[...]          # [Lp, T] f32
        # o[b, l] += sum_t hs[b, t] * hd[l, t]  (tiny f32 dot; hd tile is small)
        o_ref[...] += lax.dot_general(hs, hd, (((1,), (1,)), ((), ())),
                                      preferred_element_type=jnp.float32)


def prepare_node_co_predictor_params(w_s, b_s, w_d, b_d, *,
                                     compute_dtype=jnp.bfloat16):
    """One-time (init-time) weight preparation.

    Transposes the PyTorch-style [out, in] Linear weights to [in, out], casts to
    the compute dtype and pads to the tiled size.  Call once and reuse the
    result for every forward call (keeps weight cast/pad off the hot path)."""
    D = w_s.shape[0]
    Dp, _ = _choose_tiles(D)
    wsT = _pad2(jnp.asarray(w_s).T.astype(compute_dtype), Dp, Dp)
    wdT = _pad2(jnp.asarray(w_d).T.astype(compute_dtype), Dp, Dp)
    bs = _pad2(jnp.asarray(b_s).astype(jnp.float32).reshape(1, D), 1, Dp)
    bd = _pad2(jnp.asarray(b_d).astype(jnp.float32).reshape(1, D), 1, Dp)
    return dict(wsT=wsT, bs=bs, wdT=wdT, bd=bd, in_dim=D,
                compute_dtype=compute_dtype)


def node_co_predictor(src, dst, params):
    """src: [B, D], dst: [L, D]; params from prepare_node_co_predictor_params().
    Returns o: [B, L] float32 == einsum('bd,ld->bl', W_s(src), W_d(dst))."""
    D = params["in_dim"]
    compute_dtype = params["compute_dtype"]
    wsT, bs, wdT, bd = params["wsT"], params["bs"], params["wdT"], params["bd"]

    B, _ = src.shape
    L, _ = dst.shape
    Dp, T = _choose_tiles(D)
    n_tiles = Dp // T

    # bf16 packs 16 rows per vreg; keep row padding minimal (no L -> 128 blowup).
    Bp = _round_up(B, _BF16_SUBLANE)
    Lp = _round_up(L, _BF16_SUBLANE)

    src_p = _pad2(src.astype(compute_dtype), Bp, Dp)
    dst_p = _pad2(dst.astype(compute_dtype), Lp, Dp)

    itemsize = jnp.dtype(compute_dtype).itemsize
    flops = 2 * (Bp + Lp) * Dp * Dp + 2 * Bp * Lp * Dp
    bytes_accessed = (((Bp + Lp) * Dp + 2 * Dp * Dp) * itemsize
                      + 2 * Dp * 4 + Bp * Lp * 4)
    cost = pl.CostEstimate(flops=flops, transcendentals=0,
                           bytes_accessed=bytes_accessed)

    # Actual VMEM footprint: double-buffered input blocks + scratch + resident out.
    footprint = (
        2 * ((Bp + Lp) * T + 2 * T * T) * itemsize   # src/dst/weight tiles, x2 bufs
        + 2 * 2 * T * 4                              # bias tiles, x2 bufs (f32)
        + (Bp + Lp) * T * 4                          # f32 scratch accumulators
        + Bp * Lp * 4                                # resident f32 output block
    )
    vmem_limit = int(min(48 * 2**20, max(32 * 2**20, 2 * footprint)))

    grid_spec = pltpu.PrefetchScalarGridSpec(
        num_scalar_prefetch=0,
        grid=(n_tiles, n_tiles),                       # (N output tiles, K reduction tiles)
        in_specs=[
            pl.BlockSpec((Bp, T), lambda n, k: (0, k)),    # src
            pl.BlockSpec((Lp, T), lambda n, k: (0, k)),    # dst
            pl.BlockSpec((T, T), lambda n, k: (k, n)),     # W_s^T  [in, out]
            pl.BlockSpec((1, T), lambda n, k: (0, n)),     # b_s
            pl.BlockSpec((T, T), lambda n, k: (k, n)),     # W_d^T  [in, out]
            pl.BlockSpec((1, T), lambda n, k: (0, n)),     # b_d
        ],
        out_specs=pl.BlockSpec((Bp, Lp), lambda n, k: (0, 0)),
        scratch_shapes=[
            pltpu.VMEM((Bp, T), jnp.float32),   # hs tile accumulator
            pltpu.VMEM((Lp, T), jnp.float32),   # hd tile accumulator
        ],
    )

    out_p = pl.pallas_call(
        _node_co_predictor_kernel,
        out_shape=jax.ShapeDtypeStruct((Bp, Lp), jnp.float32),
        grid_spec=grid_spec,
        compiler_params=pltpu.CompilerParams(
            # Both axes accumulate into the same output block -> reductions.
            dimension_semantics=("arbitrary", "arbitrary"),
            vmem_limit_bytes=vmem_limit,
        ),
        cost_estimate=cost,
    )(src_p, dst_p, wsT, bs, wdT, bd)

    # Padded rows/cols (which pick up the bias) live only in the sliced-away region.
    return out_p[:B, :L]


if __name__ == "__main__":
    # Small shapes consistent with the module's forward: src [B, D], dst [L, D].
    B, L, D = 8, 16, 128

    key = jax.random.PRNGKey(0)
    k_src, k_dst, k_ws, k_bs, k_wd, k_bd = jax.random.split(key, 6)

    src = jax.random.normal(k_src, (B, D), dtype=jnp.float32)
    dst = jax.random.normal(k_dst, (L, D), dtype=jnp.float32)

    # PyTorch-style Linear parameters: weight [out, in], bias [out].
    bound = 1.0 / (D ** 0.5)
    w_s = jax.random.uniform(k_ws, (D, D), jnp.float32, -bound, bound)
    b_s = jax.random.uniform(k_bs, (D,), jnp.float32, -bound, bound)
    w_d = jax.random.uniform(k_wd, (D, D), jnp.float32, -bound, bound)
    b_d = jax.random.uniform(k_bd, (D,), jnp.float32, -bound, bound)

    # One-time weight prep (would live at module-init time in a real model).
    params = prepare_node_co_predictor_params(w_s, b_s, w_d, b_d)

    out = node_co_predictor(src, dst, params)
    out = jax.block_until_ready(out)
    assert out.shape == (B, L)

    # Reference 1: same bf16 quantization path as the kernel (f32 accumulation,
    # f32 final contraction).
    cd = jnp.bfloat16
    dn = (((1,), (0,)), ((), ()))
    hs_ref = lax.dot_general(src.astype(cd), w_s.T.astype(cd), dn,
                             preferred_element_type=jnp.float32) + b_s
    hd_ref = lax.dot_general(dst.astype(cd), w_d.T.astype(cd), dn,
                             preferred_element_type=jnp.float32) + b_d
    ref_bf16 = jnp.einsum("bd,ld->bl", hs_ref, hd_ref)
    assert jnp.allclose(out, ref_bf16, atol=2e-2, rtol=2e-2)

    # Reference 2: full-f32 PyTorch-equivalent forward.  Only bf16 input/weight
    # quantization differs now (final dot is f32), so tolerance is much tighter
    # than the previous 3e-1.
    ref_f32 = jnp.einsum("bd,ld->bl", src @ w_s.T + b_s, dst @ w_d.T + b_d)
    assert jnp.allclose(out, ref_f32, atol=1.5e-1, rtol=5e-2)

    print("KERNEL_OK")
</pallas_src>

<mosaic_0001>
module attributes {stable_mosaic.version = 11 : i64} {
  func.func @_node_co_predictor_kernel(%arg0: i32, %arg1: i32, %arg2: memref<16x128xbf16, #tpu.memory_space<vmem>>, %arg3: memref<16x128xbf16, #tpu.memory_space<vmem>>, %arg4: memref<128x128xbf16, #tpu.memory_space<vmem>>, %arg5: memref<1x128xf32, #tpu.memory_space<vmem>>, %arg6: memref<128x128xbf16, #tpu.memory_space<vmem>>, %arg7: memref<1x128xf32, #tpu.memory_space<vmem>>, %arg8: memref<16x16xf32, #tpu.memory_space<vmem>>, %arg9: memref<16x128xf32, #tpu.memory_space<vmem>>, %arg10: memref<16x128xf32, #tpu.memory_space<vmem>>) attributes {dimension_semantics = [#tpu.dimension_semantics<arbitrary>, #tpu.dimension_semantics<arbitrary>], iteration_bounds = array<i64: 1, 1>, scalar_prefetch = 0 : i64, scratch_operands = 2 : i64, tpu.core_type = #tpu.core_type<tc>, window_params = [{transform_indices = @transform_0, window_bounds = array<i64: 16, 128>}, {transform_indices = @transform_1, window_bounds = array<i64: 16, 128>}, {transform_indices = @transform_2, window_bounds = array<i64: 128, 128>}, {transform_indices = @transform_3, window_bounds = array<i64: 1, 128>}, {transform_indices = @transform_4, window_bounds = array<i64: 128, 128>}, {transform_indices = @transform_5, window_bounds = array<i64: 1, 128>}, {pipeline_mode = #tpu.pipeline_mode<synchronous>, transform_indices = @transform_6, window_bounds = array<i64: 16, 16>}]} {
    %c0_i32 = arith.constant 0 : i32
    %0 = arith.cmpi eq, %arg0, %c0_i32 : i32
    %c0_i32_0 = arith.constant 0 : i32
    %1 = arith.cmpi eq, %arg1, %c0_i32_0 : i32
    %2 = arith.andi %0, %1 : i1
    %3 = arith.extui %2 : i1 to i32
    %c0_i32_1 = arith.constant 0 : i32
    %4 = arith.cmpi ne, %3, %c0_i32_1 : i32
    scf.if %4 {
      %cst_22 = arith.constant 0.000000e+00 : f32
      %23 = vector.broadcast %cst_22 : f32 to vector<16x16xf32>
      %c0_23 = arith.constant 0 : index
      %c0_24 = arith.constant 0 : index
      %24 = vector.load %arg8[%c0_23, %c0_24] : memref<16x16xf32, #tpu.memory_space<vmem>>, vector<16x16xf32>
      tpu.vector_store %arg8[%c0_23, %c0_24], %23 {strides = array<i32>} : memref<16x16xf32, #tpu.memory_space<vmem>>, vector<16x16xf32>,
    } else {
    }
    %c0_i32_2 = arith.constant 0 : i32
    %5 = arith.cmpi eq, %arg1, %c0_i32_2 : i32
    %6 = arith.extui %5 : i1 to i32
    %c0_i32_3 = arith.constant 0 : i32
    %7 = arith.cmpi ne, %6, %c0_i32_3 : i32
    scf.if %7 {
      %cst_22 = arith.constant 0.000000e+00 : f32
      %23 = vector.broadcast %cst_22 : f32 to vector<16x128xf32>
      %c0_23 = arith.constant 0 : index
      %c0_24 = arith.constant 0 : index
      %24 = vector.load %arg9[%c0_23, %c0_24] : memref<16x128xf32, #tpu.memory_space<vmem>>, vector<16x128xf32>
      tpu.vector_store %arg9[%c0_23, %c0_24], %23 {strides = array<i32>} : memref<16x128xf32, #tpu.memory_space<vmem>>, vector<16x128xf32>,
      %cst_25 = arith.constant 0.000000e+00 : f32
      %25 = vector.broadcast %cst_25 : f32 to vector<16x128xf32>
      %c0_26 = arith.constant 0 : index
      %c0_27 = arith.constant 0 : index
      %26 = vector.load %arg10[%c0_26, %c0_27] : memref<16x128xf32, #tpu.memory_space<vmem>>, vector<16x128xf32>
      tpu.vector_store %arg10[%c0_26, %c0_27], %25 {strides = array<i32>} : memref<16x128xf32, #tpu.memory_space<vmem>>, vector<16x128xf32>,
    } else {
    }
    %c0 = arith.constant 0 : index
    %c0_4 = arith.constant 0 : index
    %8 = vector.load %arg9[%c0, %c0_4] : memref<16x128xf32, #tpu.memory_space<vmem>>, vector<16x128xf32>
    %c0_5 = arith.constant 0 : index
    %c0_6 = arith.constant 0 : index
    %9 = vector.load %arg2[%c0_5, %c0_6] : memref<16x128xbf16, #tpu.memory_space<vmem>>, vector<16x128xbf16>
    %c0_7 = arith.constant 0 : index
    %c0_8 = arith.constant 0 : index
    %10 = vector.load %arg4[%c0_7, %c0_8] : memref<128x128xbf16, #tpu.memory_space<vmem>>, vector<128x128xbf16>
    %cst = arith.constant dense<0.000000e+00> : vector<16x128xf32>
    %11 = tpu.matmul %9, %10, %cst {dimension_numbers = #tpu.dot_dimension_numbers<[1], [0], [0], [1], [0, 0, 1, 1], [], []>} : vector<16x128xbf16>, vector<128x128xbf16>, vector<16x128xf32> -> vector<16x128xf32>
    %12 = arith.addf %8, %11 : vector<16x128xf32>
    %c0_9 = arith.constant 0 : index
    %c0_10 = arith.constant 0 : index
    %13 = vector.load %arg9[%c0_9, %c0_10] : memref<16x128xf32, #tpu.memory_space<vmem>>, vector<16x128xf32>
    tpu.vector_store %arg9[%c0_9, %c0_10], %12 {strides = array<i32>} : memref<16x128xf32, #tpu.memory_space<vmem>>, vector<16x128xf32>,
    %c0_11 = arith.constant 0 : index
    %c0_12 = arith.constant 0 : index
    %14 = vector.load %arg10[%c0_11, %c0_12] : memref<16x128xf32, #tpu.memory_space<vmem>>, vector<16x128xf32>
    %c0_13 = arith.constant 0 : index
    %c0_14 = arith.constant 0 : index
    %15 = vector.load %arg3[%c0_13, %c0_14] : memref<16x128xbf16, #tpu.memory_space<vmem>>, vector<16x128xbf16>
    %c0_15 = arith.constant 0 : index
    %c0_16 = arith.constant 0 : index
    %16 = vector.load %arg6[%c0_15, %c0_16] : memref<128x128xbf16, #tpu.memory_space<vmem>>, vector<128x128xbf16>
    %cst_17 = arith.constant dense<0.000000e+00> : vector<16x128xf32>
    %17 = tpu.matmul %15, %16, %cst_17 {dimension_numbers = #tpu.dot_dimension_numbers<[1], [0], [0], [1], [0, 0, 1, 1], [], []>} : vector<16x128xbf16>, vector<128x128xbf16>, vector<16x128xf32> -> vector<16x128xf32>
    %18 = arith.addf %14, %17 : vector<16x128xf32>
    %c0_18 = arith.constant 0 : index
    %c0_19 = arith.constant 0 : index
    %19 = vector.load %arg10[%c0_18, %c0_19] : memref<16x128xf32, #tpu.memory_space<vmem>>, vector<16x128xf32>
    tpu.vector_store %arg10[%c0_18, %c0_19], %18 {strides = array<i32>} : memref<16x128xf32, #tpu.memory_space<vmem>>, vector<16x128xf32>,
    %c0_i32_20 = arith.constant 0 : i32
    %20 = arith.cmpi eq, %arg1, %c0_i32_20 : i32
    %21 = arith.extui %20 : i1 to i32
    %c0_i32_21 = arith.constant 0 : i32
    %22 = arith.cmpi ne, %21, %c0_i32_21 : i32
    scf.if %22 {
      %c0_22 = arith.constant 0 : index
      %c0_23 = arith.constant 0 : index
      %23 = vector.load %arg9[%c0_22, %c0_23] : memref<16x128xf32, #tpu.memory_space<vmem>>, vector<16x128xf32>
      %c0_24 = arith.constant 0 : index
      %c0_25 = arith.constant 0 : index
      %24 = vector.load %arg5[%c0_24, %c0_25] : memref<1x128xf32, #tpu.memory_space<vmem>>, vector<1x128xf32>
      %25 = vector.broadcast %24 : vector<1x128xf32> to vector<16x128xf32>
      %26 = arith.addf %23, %25 : vector<16x128xf32>
      %c0_26 = arith.constant 0 : index
      %c0_27 = arith.constant 0 : index
      %27 = vector.load %arg10[%c0_26, %c0_27] : memref<16x128xf32, #tpu.memory_space<vmem>>, vector<16x128xf32>
      %c0_28 = arith.constant 0 : index
      %c0_29 = arith.constant 0 : index
      %28 = vector.load %arg7[%c0_28, %c0_29] : memref<1x128xf32, #tpu.memory_space<vmem>>, vector<1x128xf32>
      %29 = vector.broadcast %28 : vector<1x128xf32> to vector<16x128xf32>
      %30 = arith.addf %27, %29 : vector<16x128xf32>
      %c0_30 = arith.constant 0 : index
      %c0_31 = arith.constant 0 : index
      %31 = vector.load %arg8[%c0_30, %c0_31] : memref<16x16xf32, #tpu.memory_space<vmem>>, vector<16x16xf32>
      %cst_32 = arith.constant dense<0.000000e+00> : vector<16x16xf32>
      %32 = tpu.matmul %26, %30, %cst_32 {dimension_numbers = #tpu.dot_dimension_numbers<[1], [1], [0], [0], [0, 0, 1, 0], [], []>} : vector<16x128xf32>, vector<16x128xf32>, vector<16x16xf32> -> vector<16x16xf32>
      %33 = arith.addf %31, %32 : vector<16x16xf32>
      %c0_33 = arith.constant 0 : index
      %c0_34 = arith.constant 0 : index
      %34 = vector.load %arg8[%c0_33, %c0_34] : memref<16x16xf32, #tpu.memory_space<vmem>>, vector<16x16xf32>
      tpu.vector_store %arg8[%c0_33, %c0_34], %33 {strides = array<i32>} : memref<16x16xf32, #tpu.memory_space<vmem>>, vector<16x16xf32>,
    } else {
    }
    return
  }
  func.func @transform_0(%arg0: i32, %arg1: i32) -> (i32, i32) {
    %c0_i32 = arith.constant 0 : i32
    %c0_i32_0 = arith.constant 0 : i32
    return %c0_i32, %arg1 : i32, i32
  }
  func.func @transform_1(%arg0: i32, %arg1: i32) -> (i32, i32) {
    %c0_i32 = arith.constant 0 : i32
    %c0_i32_0 = arith.constant 0 : i32
    return %c0_i32, %arg1 : i32, i32
  }
  func.func @transform_2(%arg0: i32, %arg1: i32) -> (i32, i32) {
    %c0_i32 = arith.constant 0 : i32
    return %arg1, %arg0 : i32, i32
  }
  func.func @transform_3(%arg0: i32, %arg1: i32) -> (i32, i32) {
    %c0_i32 = arith.constant 0 : i32
    %c0_i32_0 = arith.constant 0 : i32
    return %c0_i32, %arg0 : i32, i32
  }
  func.func @transform_4(%arg0: i32, %arg1: i32) -> (i32, i32) {
    %c0_i32 = arith.constant 0 : i32
    return %arg1, %arg0 : i32, i32
  }
  func.func @transform_5(%arg0: i32, %arg1: i32) -> (i32, i32) {
    %c0_i32 = arith.constant 0 : i32
    %c0_i32_0 = arith.constant 0 : i32
    return %c0_i32, %arg0 : i32, i32
  }
  func.func @transform_6(%arg0: i32, %arg1: i32) -> (i32, i32) {
    %c0_i32 = arith.constant 0 : i32
    %c0_i32_0 = arith.constant 0 : i32
    %c0_i32_1 = arith.constant 0 : i32
    return %c0_i32, %c0_i32_0 : i32, i32
  }
}

</mosaic_0001>

<bundles_post_ra>
// kernel: tpu_custom_call.1
= control target key start
LH: loop header
LB: loop body
LE: loop exit
PB: predicated region body
PF: predicated region fallthrough
CT: control target
= control target key end

     0   :  { %11 = vsyncpa [#allocation5], 0  ;;  %s842_s0 = inlined_call_operand.hbm [shape: bf16[16,128], index: 0, kind: input, shape index: {}]   ;;  %s843_s1 = inlined_call_operand.hbm [shape: bf16[16,128], index: 1, kind: input, shape index: {}]   ;;  %s844_s2 = inlined_call_operand.hbm [shape: bf16[128,128], index: 2, kind: input, shape index: {}]   ;;  %s845_s3 = inlined_call_operand.vmem [shape: f32[1,128], index: 3, kind: input, shape index: {}]   ;;  %s846_s4 = inlined_call_operand.hbm [shape: bf16[128,128], index: 4, kind: input, shape index: {}]   ;;  %s847_s5 = inlined_call_operand.vmem [shape: f32[1,128], index: 5, kind: input, shape index: {}]   ;;  %s848_s6 = inlined_call_operand.hbm [shape: f32[16,16], index: 6, kind: output, shape index: {}]  }
   0x1   :  { %12 = vsyncpa [#allocation8], 0 }
   0x2   :  { %13 = vsyncpa [#allocation11], 0 }
   0x3   :  { %14 = vsyncpa [#allocation6], 0  ;;  %s700_s21 = smov [#allocation7]   ;;  %s701_s23 = smov [#allocation4]  }
   0x4   :  { %s32_s22 = sshll.u32 %s700_s21, 4  ;;  %s20_s24 = sshll.u32 %s701_s23, 4  ;;  %s33_s22 = int_to_ptr.vmem [resolvable:$true] %s32_s22  ;;  %s746_s24 = int_to_ptr.vmem [resolvable:$true] %s20_s24 }
   0x5   :  { %s582_s27 = scalar_lea.hbm %s843_s1, 128 }
   0x6   :  { %p583_p0 = scmp.ne.s32.totalorder %s843_s1, %s582_s27  ;;  %p586_p1 = scmp.lt.u32.totalorder %s582_s27, %s843_s1 }
   0x8   :  { %p588_p2 = pnand %p586_p1, %p583_p0 }
   0xa   :  { %591 = shalt.err (!%p588_p2)
}
   0xb   :  { %s592_s8 = scalar_lea.vmem %s33_s22, 128  ;;  %p597_p4 = scmp.lt.s32.totalorder %s33_s22, %s33_s22 }
   0xc   :  { %p593_p3 = scmp.ne.s32.totalorder %s33_s22, %s592_s8  ;;  %p598_p5 = scmp.lt.s32.totalorder %s592_s8, %s592_s8 }
   0xe   :  { %p599_p6 = por %p598_p5, %p597_p4 }
  0x10   :  { %p600_p7 = pnand %p599_p6, %p593_p3 }
  0x12   :  { %603 = shalt.err (!%p600_p7)
}
  0x13   :  { %s702_s9 = smov 64   ;;  %s703_s10 = smov 4  }
  0x14   :  { %38 = dma.hbm_to_vmem [thread:$0]  %s843_s1, 128, %s33_s22, [#allocation8], %s702_s9, %s702_s9, %s703_s10  }
  0x15   :  { %s604_s15 = scalar_lea.hbm %s842_s0, 128 }
  0x16   :  { %p605_p8 = scmp.ne.s32.totalorder %s842_s0, %s604_s15  ;;  %p608_p9 = scmp.lt.u32.totalorder %s604_s15, %s842_s0 }
  0x18   :  { %p610_p10 = pnand %p608_p9, %p605_p8 }
  0x1a   :  { %613 = shalt.err (!%p610_p10)
}
  0x1b   :  { %s614_s20 = scalar_lea.vmem %s746_s24, 128  ;;  %p619_p12 = scmp.lt.s32.totalorder %s746_s24, %s746_s24 }
  0x1c   :  { %p615_p11 = scmp.ne.s32.totalorder %s746_s24, %s614_s20  ;;  %p620_p13 = scmp.lt.s32.totalorder %s614_s20, %s614_s20 }
  0x1e   :  { %p621_p0 = por %p620_p13, %p619_p12 }
  0x20   :  { %p622_p1 = pnand %p621_p0, %p615_p11 }
  0x22   :  { %625 = shalt.err (!%p622_p1)
}
  0x23   :  { %26 = dma.hbm_to_vmem [thread:$0]  %s842_s0, 128, %s746_s24, [#allocation5], %s702_s9, %s702_s9, %s703_s10  }
  0x24   :  { %s704_s22 = smov [#allocation9]   ;;  %s705_s25 = smov [#allocation10]  }
  0x25   :  { %s44_s23 = sshll.u32 %s704_s22, 4  ;;  %s58_s26 = sshll.u32 %s705_s25, 4  ;;  %s45_s23 = int_to_ptr.vmem [resolvable:$true] %s44_s23  ;;  %s783_s26 = int_to_ptr.vmem [resolvable:$true] %s58_s26 }
  0x26   :  { %s626_s29 = scalar_lea.hbm %s844_s2, 1024 }
  0x27   :  { %p627_p2 = scmp.ne.s32.totalorder %s844_s2, %s626_s29  ;;  %p630_p3 = scmp.lt.u32.totalorder %s626_s29, %s844_s2 }
  0x29   :  { %p632_p4 = pnand %p630_p3, %p627_p2 }
  0x2b   :  { %635 = shalt.err (!%p632_p4)
}
  0x2c   :  { %s636_s0 = scalar_lea.vmem %s45_s23, 1024  ;;  %p641_p6 = scmp.lt.s32.totalorder %s45_s23, %s45_s23 }
  0x2d   :  { %p637_p5 = scmp.ne.s32.totalorder %s45_s23, %s636_s0  ;;  %p642_p7 = scmp.lt.s32.totalorder %s636_s0, %s636_s0 }
  0x2f   :  { %p643_p8 = por %p642_p7, %p641_p6 }
  0x31   :  { %p644_p9 = pnand %p643_p8, %p637_p5 }
  0x33   :  { %647 = shalt.err (!%p644_p9)
}
  0x34   :  { %50 = dma.hbm_to_vmem [thread:$0]  %s844_s2, 1024, %s45_s23, [#allocation8], %s702_s9, %s702_s9, %s703_s10  }
  0x35   :  { %s648_s15 = scalar_lea.hbm %s846_s4, 1024 }
  0x36   :  { %p649_p10 = scmp.ne.s32.totalorder %s846_s4, %s648_s15  ;;  %p652_p11 = scmp.lt.u32.totalorder %s648_s15, %s846_s4 }
  0x38   :  { %p654_p12 = pnand %p652_p11, %p649_p10 }
  0x3a   :  { %657 = shalt.err (!%p654_p12)
}
  0x3b   :  { %s658_s20 = scalar_lea.vmem %s783_s26, 1024  ;;  %p663_p0 = scmp.lt.s32.totalorder %s783_s26, %s783_s26 }
  0x3c   :  { %p659_p13 = scmp.ne.s32.totalorder %s783_s26, %s658_s20  ;;  %p664_p1 = scmp.lt.s32.totalorder %s658_s20, %s658_s20 }
  0x3e   :  { %p665_p2 = por %p664_p1, %p663_p0 }
  0x40   :  { %p666_p3 = pnand %p665_p2, %p659_p13 }
  0x42   :  { %669 = shalt.err (!%p666_p3)
}
  0x43   :  { %64 = dma.hbm_to_vmem [thread:$0]  %s846_s4, 1024, %s783_s26, [#allocation11], %s702_s9, %s702_s9, %s703_s10  }
  0x44   :  { %692 = dma.done.wait [#allocation5], 128  }
  0x45   :  { %693 = vsyncadd [#allocation5], 4294967168 }
  0x46   :  { %694 = dma.done.wait [#allocation8], 1152  }
  0x47   :  { %695 = vsyncadd [#allocation8], 4294966144 }
  0x48   :  { %696 = dma.done.wait [#allocation11], 1024  }
  0x49   :  { %697 = vsyncadd [#allocation11], 4294966272  ;;  %v706_v0 = vmov 0.0   ;;  %vm707_vm0 = vmmov 0   ;;  %v564_v1 = vld [vmem:[#allocation10] sm:$0xff]   ;;  %v565_v2 = vld [vmem:[#allocation10 + $0x8] sm:$0xff]  }
  0x4a   :  { %522 = vmatprep.subr.bf16.mxu1 %v706_v0  ;;  %502 = vmatprep.subr.bf16.mxu0 %v706_v0  ;;  %v566_v3 = vld [vmem:[#allocation9] sm:$0xff]   ;;  %v568_v4 = vld [vmem:[#allocation9 + $0x8] sm:$0xff]   ;;  %v567_v5 = vld [vmem:[#allocation10 + $0x10] sm:$0xff]   ;;  %vm86_vm1 = vcmask 130048  }
  0x4b   :  { %538 = vmatprep.mubr.msk.bf16.mxu1 %vm707_vm0, %v706_v0  ;;  %518 = vmatprep.mubr.msk.bf16.mxu0 %vm707_vm0, %v706_v0  ;;  %v570_v6 = vld [vmem:[#allocation9 + $0x10] sm:$0xff]   ;;  %v569_v7 = vld [vmem:[#allocation10 + $0x18] sm:$0xff]   ;;  %v571_v9 = vld [vmem:[#allocation10 + $0x20] sm:$0xff]   ;;  %88 = vst.msk [vmem:[#allocation12 + $0x8] sm:$0xff] %vm86_vm1, %v706_v0 }
  0x4c   :  { %523 = vmatpush3.bf16.msra.mxu1 %v564_v1  ;;  %503 = vmatpush3.bf16.msra.mxu0 %v566_v3  ;;  %v572_v8 = vld [vmem:[#allocation9 + $0x18] sm:$0xff]   ;;  %v574_v10 = vld [vmem:[#allocation9 + $0x20] sm:$0xff]   ;;  %v573_v11 = vld [vmem:[#allocation10 + $0x28] sm:$0xff]   ;;  %87 = vst.msk [vmem:[#allocation12] sm:$0xff] %vm86_vm1, %v706_v0 }
  0x4d   :  { %524 = vmatprep.subr.bf16.mxu1 %v706_v0  ;;  %504 = vmatprep.subr.bf16.mxu0 %v706_v0  ;;  %v576_v12 = vld [vmem:[#allocation9 + $0x28] sm:$0xff]   ;;  %v575_v13 = vld [vmem:[#allocation10 + $0x30] sm:$0xff]   ;;  %v577_v15 = vld [vmem:[#allocation10 + $0x38] sm:$0xff]  }
  0x4e   :  { %v579_v14 = vld [vmem:[#allocation9 + $0x30] sm:$0xff]   ;;  %v580_v16 = vld [vmem:[#allocation9 + $0x38] sm:$0xff]  }
  0x4f   :  { %v578_v17 = vld [vmem:[#allocation7] sm:$0xff]   ;;  %v581_v18 = vld [vmem:[#allocation4] sm:$0xff]  }
  0x50   :  { %525 = vmatpush3.bf16.msra.mxu1 %v565_v2  ;;  %505 = vmatpush3.bf16.msra.mxu0 %v568_v4  ;;  %v479_v20 = vld [vmem:[%s847_s5] ss:$0 sm:$0xff]  ;;  %s708_s5 = smov [#allocation12]  }
  0x51   :  { %526 = vmatprep.subr.bf16.mxu1 %v706_v0  ;;  %506 = vmatprep.subr.bf16.mxu0 %v706_v0  ;;  %v478_v21 = vld [vmem:[%s845_s3] ss:$0 sm:$0xff]  ;;  %s446_s22 = sshll.u32 %s708_s5, 4  ;;  %s447_s22 = int_to_ptr.vmem [resolvable:$true] %s446_s22 }
  0x52   :  { %v360_v34 = vld [vmem:[#allocation12 + $0x8] sm:$0xff]  ;;  %s670_s3 = scalar_lea.vmem %s447_s22, 256  ;;  %p675_p5 = scmp.lt.s32.totalorder %s447_s22, %s447_s22 }
  0x53   :  { %v359_v35 = vld [vmem:[#allocation12] sm:$0xff]  ;;  %p671_p4 = scmp.ne.s32.totalorder %s447_s22, %s670_s3  ;;  %p676_p6 = scmp.lt.s32.totalorder %s670_s3, %s670_s3 }
  0x54   :  { %527 = vmatpush3.bf16.msra.mxu1 %v567_v5  ;;  %507 = vmatpush3.bf16.msra.mxu0 %v570_v6 }
  0x55   :  { %528 = vmatprep.subr.bf16.mxu1 %v706_v0  ;;  %508 = vmatprep.subr.bf16.mxu0 %v706_v0  ;;  %p677_p7 = por %p676_p6, %p675_p5 }
  0x57   :  { %p678_p8 = pnand %p677_p7, %p671_p4 }
  0x58   :  { %529 = vmatpush3.bf16.msra.mxu1 %v569_v7  ;;  %509 = vmatpush3.bf16.msra.mxu0 %v572_v8 }
  0x59   :  { %530 = vmatprep.subr.bf16.mxu1 %v706_v0  ;;  %510 = vmatprep.subr.bf16.mxu0 %v706_v0 }
  0x5c   :  { %531 = vmatpush3.bf16.msra.mxu1 %v571_v9  ;;  %511 = vmatpush3.bf16.msra.mxu0 %v574_v10 }
  0x5d   :  { %532 = vmatprep.subr.bf16.mxu1 %v706_v0  ;;  %512 = vmatprep.subr.bf16.mxu0 %v706_v0 }
  0x60   :  { %533 = vmatpush3.bf16.msra.mxu1 %v573_v11  ;;  %513 = vmatpush3.bf16.msra.mxu0 %v576_v12 }
  0x61   :  { %534 = vmatprep.subr.bf16.mxu1 %v706_v0  ;;  %514 = vmatprep.subr.bf16.mxu0 %v706_v0 }
  0x64   :  { %535 = vmatpush3.bf16.msra.mxu1 %v575_v13  ;;  %515 = vmatpush3.bf16.msra.mxu0 %v579_v14 }
  0x65   :  { %536 = vmatprep.subr.bf16.mxu1 %v706_v0  ;;  %516 = vmatprep.subr.bf16.mxu0 %v706_v0 }
  0x68   :  { %537 = vmatpush3.bf16.msra.mxu1 %v577_v15  ;;  %517 = vmatpush3.bf16.msra.mxu0 %v580_v16 }
  0x6b   :  { %539 = vmatmul.mubr.bf16.vlgmr.msra.gmra.mrb[0].mxu1 %v578_v17  ;;  %519 = vmatmul.mubr.bf16.vlgmr.msra.gmra.mrb[0].mxu0 %v581_v18 }
 0x13e   :  { %v323_v19 = vpop.f32.mrb[0].mxu1  ;;  %v204_v24 = vpop.f32.mrb[0].mxu0 }
 0x13f   :  { %v540_v22 = vpop.f32.mrb[1].mxu1  ;;  %v357_v25 = vadd.f32 %v479_v20, %v323_v19  ;;  %v346_v28 = vadd.f32 %v478_v21, %v204_v24  ;;  %v520_v29 = vpop.f32.mrb[1].mxu0 }
 0x140   :  { %v326_v23 = vpop.f32.mrb[2].mxu1  ;;  %v207_v30 = vpop.f32.mrb[2].mxu0 }
 0x141   :  { %v358_v26 = vadd.f32 %v479_v20, %v326_v23  ;;  %v541_v27 = vpop.f32.mrb[3].mxu1  ;;  %v521_v32 = vpop.f32.mrb[3].mxu0  ;;  %546 = vmatprep.mubr.f32.mxu0 %v346_v28  ;;  %v347_v33 = vadd.f32 %v478_v21, %v207_v30 }
 0x143   :  { %v549_v31 = vpack.c.bf16 %v358_v26, %v357_v25 }
 0x145   :  { %550 = vmatprep.subr.bf16.mxu0 %v549_v31 }
 0x146   :  { %552 = vmatpush3.bf16.xpose.msra.mxu0 %v549_v31 }
 0x14d   :  { %547 = vmatmul.mubr.f32.vlgmr.msra.gmra.mrb[4].mxu0 %v347_v33 }
 0x220   :  { %v548_v36 = vpop.f32.mrb[4].mxu0 }
 0x221   :  { %v437_v37 = vadd.f32 %v548_v36, %v360_v34  ;;  %v427_v38 = vpop.f32.mrb[5].mxu0 }
 0x222   :  { %v436_v39 = vadd.f32 %v427_v38, %v359_v35 }
 0x223   :  { %440 = vst.msk [vmem:[#allocation12 + $0x8] sm:$0xff] %vm86_vm1, %v437_v37 }
 0x224   :  { %439 = vst.msk [vmem:[#allocation12] sm:$0xff] %vm86_vm1, %v436_v39 }
 0x225   :  { %681 = shalt.err (!%p678_p8)
}
 0x226   :  { %s682_s26 = scalar_lea.hbm %s848_s6, 256 }
 0x227   :  { %p683_p9 = scmp.ne.s32.totalorder %s848_s6, %s682_s26  ;;  %p686_p10 = scmp.lt.u32.totalorder %s682_s26, %s848_s6 }
 0x229   :  { %p688_p11 = pnand %p686_p10, %p683_p9 }
 0x22b   :  { %691 = shalt.err (!%p688_p11)
}
 0x22c   :  { %s709_s7 = smov 128   ;;  %s710_s8 = smov 8  }
 0x22d   :  { %452 = dma.vmem_to_hbm [thread:$0]  %s447_s22, 256, %s848_s6, [#allocation6], %s709_s7, %s709_s7, %s710_s8  }
 0x22e   :  { %698 = dma.done.wait [#allocation6], 256  }
 0x22f   :  { %699 = vsyncadd [#allocation6], 4294967040 }
 0x230   :  { %456 = vsyncpa [#allocation5], 1 }
 0x231   :  { %457 = vsyncpa [#allocation8], 1 }
 0x232   :  { %458 = vsyncpa [#allocation11], 1 }
 0x233   :  { %459 = vsyncpa [#allocation6], 1 }

</bundles_post_ra>
